<compile_context>
chip_gen: v7x
topology: tpu7x:2x2x1
jax: 0.10.0
libtpu: 0.0.40
codegen_flags: <defaults>
</compile_context>

<pallas_src>
import functools

import jax
import jax.numpy as jnp
from jax.experimental import pallas as pl
from jax.experimental.pallas import tpu as pltpu


def _round_up(x, m):
    return ((x + m - 1) // m) * m


def _clusterling_kernel(x_ref, w_ref, o_ref, *, alpha, n_clusters, k_pad):
    x = x_ref[...]              # (tm, F_pad)  f32 or bf16 (sentinel col == 1)
    w = w_ref[...]              # (K_pad, F_pad) same dtype (sentinel col == -0.5*||w||^2)

    # ||x||^2 over the real features, accumulated in f32. Padded feature columns
    # are zero; the sentinel column contributes exactly 1.0, subtract it back out.
    xf = x.astype(jnp.float32)
    x_sq = jnp.sum(xf * xf, axis=1, keepdims=True) - 1.0               # (tm, 1)

    # Single MXU matmul, contracting on the feature axis (no weight transpose).
    # The sentinel column folds -0.5*||w||^2 into the result, so:
    #   dist = ||x||^2 - 2 * (x.w - 0.5*||w||^2) = ||x - w||^2
    xw = jax.lax.dot_general(x, w, (((1,), (1,)), ((), ())),
                             preferred_element_type=jnp.float32)        # (tm, K_pad)
    dist = jnp.maximum(x_sq - 2.0 * xw, 0.0)                            # clamp cancellation

    # Student-t similarity, exponent fused at trace time (avoid log+exp when possible).
    p = (alpha + 1.0) / 2.0
    scaled = 1.0 + dist * (1.0 / alpha)
    if p == 1.0:                                                        # alpha = 1 fast path
        q = pl.reciprocal(scaled, approx=False)
    elif p == 0.5:
        q = jax.lax.rsqrt(scaled)
    elif float(p).is_integer() and 1.0 < p <= 4.0:                      # p = 2, 3, 4
        r = pl.reciprocal(scaled, approx=False)
        q = r
        for _ in range(int(p) - 1):
            q = q * r
    elif float(2.0 * p).is_integer() and 0.5 < p <= 4.0:                # p = 1.5, 2.5, 3.5
        r = pl.reciprocal(scaled, approx=False)
        q = jax.lax.rsqrt(scaled)
        for _ in range(int(p - 0.5)):
            q = q * r
    else:
        q = jnp.exp(-p * jnp.log(scaled))                               # general path (2 EUP ops)

    # Mask out padded cluster columns so they don't pollute the row sum.
    if k_pad != n_clusters:
        col = jax.lax.broadcasted_iota(jnp.int32, q.shape, 1)
        q = jnp.where(col < n_clusters, q, 0.0)

    # Row-normalize; approximate EUP reciprocal (uniform per-row scale, ~2^-12 rel).
    denom = jnp.sum(q, axis=1, keepdims=True)
    o_ref[...] = (q * pl.reciprocal(denom, approx=True)).astype(o_ref.dtype)


def clusterling_forward(x, weight, alpha=1.0, block_rows=512, use_bf16_matmul=False):
    """x: (N, F), weight: (K, F) -> (N, K) float32."""
    n, f = x.shape
    k, f_w = weight.shape
    assert f == f_w, "feature dims must match"

    # Lane-dense padding. Reserve one extra feature column as the ||w||^2 sentinel.
    f_pad = _round_up(f + 1, 128)
    k_pad = _round_up(k, 128)

    in_dtype = jnp.bfloat16 if use_bf16_matmul else jnp.float32
    in_bytes = 2 if use_bf16_matmul else 4

    # Generation-aware VMEM budget (v7x: 64 MiB/TC, v5e/v6e: 128 MiB).
    try:
        vmem_cap = int(pltpu.get_tpu_info().vmem_capacity_bytes)
    except Exception:
        vmem_cap = 64 << 20          # conservative (v7x) fallback
    budget = int(vmem_cap * 0.70)

    w_bytes = k_pad * f_pad * in_bytes          # resident weight, single-buffered
    if w_bytes > budget // 2:
        # TODO(synk): add K/F grid tiling (accumulate xw into scratch / carry row
        # sums) so the weight need not be fully VMEM-resident for very large K*F.
        raise ValueError(
            f"weight ({w_bytes} bytes padded) too large to keep VMEM-resident "
            f"within budget {budget}; K/F tiling not implemented")

    def _vmem_estimate(tm_):
        return (3 * tm_ * f_pad * in_bytes      # x block, up to triple-buffered
                + w_bytes                       # resident weight (Buffered(1))
                + 2 * tm_ * k_pad * 4           # output block, double-buffered f32
                + 2 * tm_ * k_pad * 4)          # headroom for f32 intermediates

    # Row tile: big enough to amortize per-step overhead, capped so the grid has
    # >= 2 blocks (lets the two v7x TensorCores share the "parallel" axis), and
    # shrunk in multiples of 8 until the working set fits the budget.
    tm = min(_round_up(block_rows, 8), _round_up(max(8, -(-n // 2)), 8))
    while tm > 8 and _vmem_estimate(tm) > budget:
        tm = max(8, _round_up(tm // 2, 8))
    n_pad = _round_up(n, tm)
    num_blocks = n_pad // tm
    x_buffers = 3 if num_blocks >= 3 else 2

    # Host-side padding (zeros) + sentinel column folding ||w||^2 into the matmul.
    x32 = x.astype(jnp.float32)
    w32 = weight.astype(jnp.float32)
    w_sq = jnp.sum(w32 * w32, axis=1)                                   # (K,)
    x_p = (jnp.zeros((n_pad, f_pad), jnp.float32)
           .at[:n, :f].set(x32)
           .at[:, f].set(1.0))
    w_p = (jnp.zeros((k_pad, f_pad), jnp.float32)
           .at[:k, :f].set(w32)
           .at[:k, f].set(-0.5 * w_sq))
    x_p = x_p.astype(in_dtype)
    w_p = w_p.astype(in_dtype)

    kernel = functools.partial(
        _clusterling_kernel, alpha=float(alpha), n_clusters=k, k_pad=k_pad)

    out = pl.pallas_call(
        kernel,
        out_shape=jax.ShapeDtypeStruct((n_pad, k_pad), jnp.float32),
        grid_spec=pltpu.PrefetchScalarGridSpec(
            num_scalar_prefetch=0,
            grid=(num_blocks,),
            in_specs=[
                # x row block: pipelined, deeper buffering when the grid is deep.
                pl.BlockSpec((tm, f_pad), lambda i: (i, 0),
                             pipeline_mode=pl.Buffered(x_buffers)),
                # full weight, constant index -> revisited every step; single buffer.
                pl.BlockSpec((k_pad, f_pad), lambda i: (0, 0),
                             pipeline_mode=pl.Buffered(1)),
            ],
            out_specs=pl.BlockSpec((tm, k_pad), lambda i: (i, 0)),
        ),
        compiler_params=pltpu.CompilerParams(
            # N-blocks are independent -> shards across the two TCs on v7x.
            dimension_semantics=("parallel",),
            vmem_limit_bytes=budget,
        ),
    )(x_p, w_p)

    return out[:n, :k]


def _reference(x, weight, alpha=1.0):
    """Pure-JAX mirror of the PyTorch forward (for correctness check)."""
    d = x[:, None, :] - weight[None, :, :]
    d = jnp.sum(d * d, axis=2)
    q = 1.0 + d / alpha
    q = 1.0 / q
    q = q ** ((alpha + 1.0) / 2.0)
    return q / jnp.sum(q, axis=1, keepdims=True)


if __name__ == "__main__":
    in_features = 10
    out_features = 10
    alpha = 1.0
    batch = 32

    key = jax.random.PRNGKey(0)
    kx, kw = jax.random.split(key)

    # deterministic xavier_uniform init for weight: U(-b, b), b = sqrt(6/(fan_in+fan_out))
    bound = (6.0 / (in_features + out_features)) ** 0.5
    weight = jax.random.uniform(
        kw, (out_features, in_features), dtype=jnp.float32,
        minval=-bound, maxval=bound,
    )
    x = jax.random.normal(kx, (batch, in_features), dtype=jnp.float32)

    ref = _reference(x, weight, alpha=alpha)

    # f32 path (default): tight tolerance (approx normalization reciprocal ~2^-12 rel).
    out = jax.block_until_ready(clusterling_forward(x, weight, alpha=alpha))
    assert out.shape == (batch, out_features)
    assert jnp.allclose(out, ref, atol=1e-3, rtol=1e-3), "f32 path mismatch vs reference"

    # bf16-MXU path (v6e/v7x throughput option): looser tolerance from bf16 input rounding.
    out_bf16 = jax.block_until_ready(
        clusterling_forward(x, weight, alpha=alpha, use_bf16_matmul=True))
    assert out_bf16.shape == (batch, out_features)
    assert jnp.allclose(out_bf16, ref, atol=5e-2, rtol=5e-2), "bf16 path mismatch vs reference"

    print("KERNEL_OK")
</pallas_src>

<mosaic_0001>
module attributes {stable_mosaic.version = 11 : i64} {
  func.func @_clusterling_kernel(%arg0: i32, %arg1: memref<16x128xf32, #tpu.memory_space<vmem>>, %arg2: memref<128x128xf32, #tpu.memory_space<vmem>>, %arg3: memref<16x128xf32, #tpu.memory_space<vmem>>) attributes {dimension_semantics = [#tpu.dimension_semantics<parallel>], iteration_bounds = array<i64: 2>, scalar_prefetch = 0 : i64, scratch_operands = 0 : i64, tpu.core_type = #tpu.core_type<tc>, window_params = [{pipeline_mode = #tpu.pipeline_mode<double_buffered>, transform_indices = @transform_0, window_bounds = array<i64: 16, 128>}, {pipeline_mode = #tpu.pipeline_mode<synchronous>, transform_indices = @transform_1, window_bounds = array<i64: 128, 128>}, {transform_indices = @transform_2, window_bounds = array<i64: 16, 128>}]} {
    %c0 = arith.constant 0 : index
    %c0_0 = arith.constant 0 : index
    %0 = vector.load %arg1[%c0, %c0_0] : memref<16x128xf32, #tpu.memory_space<vmem>>, vector<16x128xf32>
    %c0_1 = arith.constant 0 : index
    %c0_2 = arith.constant 0 : index
    %1 = vector.load %arg2[%c0_1, %c0_2] : memref<128x128xf32, #tpu.memory_space<vmem>>, vector<128x128xf32>
    %2 = arith.mulf %0, %0 : vector<16x128xf32>
    %cst = arith.constant dense<0.000000e+00> : vector<16xf32>
    %3 = vector.multi_reduction <add>, %2, %cst [1] : vector<16x128xf32> to vector<16xf32>
    %4 = vector.shape_cast %3 : vector<16xf32> to vector<16x1xf32>
    %cst_3 = arith.constant 1.000000e+00 : f32
    %5 = vector.broadcast %cst_3 : f32 to vector<16x1xf32>
    %6 = arith.subf %4, %5 : vector<16x1xf32>
    %cst_4 = arith.constant dense<0.000000e+00> : vector<16x128xf32>
    %7 = tpu.matmul %0, %1, %cst_4 {dimension_numbers = #tpu.dot_dimension_numbers<[1], [1], [0], [0], [0, 0, 1, 0], [], []>} : vector<16x128xf32>, vector<128x128xf32>, vector<16x128xf32> -> vector<16x128xf32>
    %cst_5 = arith.constant 2.000000e+00 : f32
    %8 = vector.broadcast %cst_5 : f32 to vector<16x128xf32>
    %9 = arith.mulf %8, %7 : vector<16x128xf32>
    %10 = vector.broadcast %6 : vector<16x1xf32> to vector<16x128xf32>
    %11 = arith.subf %10, %9 : vector<16x128xf32>
    %cst_6 = arith.constant 0.000000e+00 : f32
    %12 = vector.broadcast %cst_6 : f32 to vector<16x128xf32>
    %13 = arith.maximumf %11, %12 : vector<16x128xf32>
    %cst_7 = arith.constant 1.000000e+00 : f32
    %14 = vector.broadcast %cst_7 : f32 to vector<16x128xf32>
    %15 = arith.mulf %13, %14 : vector<16x128xf32>
    %cst_8 = arith.constant 1.000000e+00 : f32
    %16 = vector.broadcast %cst_8 : f32 to vector<16x128xf32>
    %17 = arith.addf %16, %15 : vector<16x128xf32>
    %18 = tpu.reciprocal %17 : vector<16x128xf32> -> vector<16x128xf32>
    %19 = tpu.iota {dimensions = array<i32: 1>} : vector<16x128xi32>
    %c10_i32 = arith.constant 10 : i32
    %20 = vector.broadcast %c10_i32 : i32 to vector<16x128xi32>
    %21 = arith.cmpi slt, %19, %20 : vector<16x128xi32>
    %cst_9 = arith.constant 0.000000e+00 : f32
    %22 = vector.broadcast %cst_9 : f32 to vector<16x128xf32>
    %23 = arith.select %21, %18, %22 : vector<16x128xi1>, vector<16x128xf32>
    %cst_10 = arith.constant dense<0.000000e+00> : vector<16xf32>
    %24 = vector.multi_reduction <add>, %23, %cst_10 [1] : vector<16x128xf32> to vector<16xf32>
    %25 = vector.shape_cast %24 : vector<16xf32> to vector<16x1xf32>
    %26 = tpu.reciprocal %25 {approx = true} : vector<16x1xf32> -> vector<16x1xf32>
    %27 = vector.broadcast %26 : vector<16x1xf32> to vector<16x128xf32>
    %28 = arith.mulf %23, %27 : vector<16x128xf32>
    %c0_11 = arith.constant 0 : index
    %c0_12 = arith.constant 0 : index
    %29 = vector.load %arg3[%c0_11, %c0_12] : memref<16x128xf32, #tpu.memory_space<vmem>>, vector<16x128xf32>
    tpu.vector_store %arg3[%c0_11, %c0_12], %28 {strides = array<i32>} : memref<16x128xf32, #tpu.memory_space<vmem>>, vector<16x128xf32>,
    return
  }
  func.func @transform_0(%arg0: i32) -> (i32, i32) {
    %c0_i32 = arith.constant 0 : i32
    %c0_i32_0 = arith.constant 0 : i32
    return %arg0, %c0_i32 : i32, i32
  }
  func.func @transform_1(%arg0: i32) -> (i32, i32) {
    %c0_i32 = arith.constant 0 : i32
    %c0_i32_0 = arith.constant 0 : i32
    %c0_i32_1 = arith.constant 0 : i32
    return %c0_i32, %c0_i32_0 : i32, i32
  }
  func.func @transform_2(%arg0: i32) -> (i32, i32) {
    %c0_i32 = arith.constant 0 : i32
    %c0_i32_0 = arith.constant 0 : i32
    return %arg0, %c0_i32 : i32, i32
  }
}

</mosaic_0001>

<bundles_post_ra>
// kernel: tpu_custom_call.1
= control target key start
LH: loop header
LB: loop body
LE: loop exit
PB: predicated region body
PF: predicated region fallthrough
CT: control target
= control target key end

     0   :  { %7 = vsyncpa [#allocation3], 0  ;;  %s939_s0 = inlined_call_operand.hbm [shape: f32[32,128], index: 0, kind: input, shape index: {}]   ;;  %s940_s1 = inlined_call_operand.hbm [shape: f32[128,128], index: 1, kind: input, shape index: {}]   ;;  %s941_s2 = inlined_call_operand.hbm [shape: f32[32,128], index: 2, kind: output, shape index: {}]  }
   0x1   :  { %9 = vsyncpa [#allocation3 + $0x1], 0 }
   0x2   :  { %10 = vsyncpa [#allocation6], 0 }
   0x3   :  { %11 = vsyncpa [#allocation4], 0 }
   0x4   :  { %13 = vsyncpa [#allocation4 + $0x1], 0  ;;  %s728_s9 = smov 0   ;;  %s730_s10 = smov 0  }
   0x5   :  { %s732_s11 = smov 0   ;;  %s734_s12 = smov 0  }
   0x6 LB: > { %s749_s13 = sadd.s32 4294967295, %s704_s12   ;;  %s402_s14 = sadd.s32 4294967294, %s704_s12   ;;  %s704_s12 = sphi %s734_s12, %s961_s12   ;;  %s700_s11 = sphi %s732_s11, %s960_s11   ;;  %s696_s10 = sphi %s730_s10, %s959_s10   ;;  %s692_s9 = sphi %s728_s9, %s958_s9  }
   0x7   : > { %p39_p0 = scmp.ne.s32.totalorder %s696_s10, %s692_s9  ;;  %p942_p1 = scmp.eq.s32.totalorder %s749_s13, 0 }
   0x8   : > { %p90_p3 = scmp.eq.s32.totalorder %s402_s14, 1  ;;  %p403_p5 = scmp.ge.s32.totalorder %s704_s12, 1 }
   0x9   : > { %p758_p4 = por %p942_p1, %p39_p0  ;;  %p97_p7 = scmp.lt.s32.totalorder %s704_s12, 3 }
   0xa   : > { %p763_p6 = por %p90_p3, %p39_p0  ;;  %s706_s18 = smov [#allocation5]  }
   0xb   : > { %s945_s15 = scalar_select %p758_p4, 1, 0 }
   0xc   : > { %s946_s16 = scalar_select %p763_p6, 1, 0 }
   0xd   : > { %p768_p8 = pnand %p403_p5, %p97_p7  ;;  %s109_s19 = sshll.u32 %s706_s18, 4  ;;  %s772_s19 = int_to_ptr.vmem [resolvable:$true] %s109_s19 }
   0xe   : > { %s784_s21 = sadd.s32 1, %s704_s12   ;;  %s26_s22 = sadd.s32 1, %s700_s11 }
   0xf   : > { %s947_s17 = scalar_select %p768_p8, 1, 0 }
  0x10   : > { %p515_p9 = pneg %p768_p8  ;;  %s23_s23 = ssub.s32 %s704_s12, %s784_s21 }
  0x11   : > { %s576_s26 = scalar_lea.hbm %s940_s1, 2048 }
  0x12   : > { %p779_p11 = pnand %p515_p9, %p942_p1  ;;  %p577_p12 = scmp.ne.s32.totalorder %s940_s1, %s576_s26 }
  0x13   : > { %p583_p5 = scmp.lt.u32.totalorder %s576_s26, %s940_s1 }
  0x14   : > { %p578_p13 = pneg %p779_p11 }
  0x16   : > { %p579_p0 = pnand %p578_p13, %p577_p12 }
  0x18   : > { %p580_p3 = pneg %p579_p0 }
  0x1a   : > { %p585_p7 = pnand %p583_p5, %p580_p3 }
  0x1c   : > { %588 = shalt.err (!%p585_p7)
}
  0x1d   : > { %s589_s3 = scalar_lea.vmem %s772_s19, 2048  ;;  %p597_p2 = scmp.lt.s32.totalorder %s772_s19, %s772_s19 }
  0x1e   : > { %p590_p9 = scmp.ne.s32.totalorder %s772_s19, %s589_s3  ;;  %p598_p6 = scmp.lt.s32.totalorder %s589_s3, %s589_s3 }
  0x20   : > { %p592_p10 = pnand %p590_p9, %p578_p13  ;;  %p599_p4 = por %p598_p6, %p597_p2 }
  0x22   : > { %p593_p1 = pneg %p592_p10 }
  0x24   : > { %p600_p8 = pnand %p599_p4, %p593_p1 }
  0x26   : > { %603 = shalt.err (!%p600_p8)
}
  0x27   : > { %s707_s4 = smov 128   ;;  %s708_s5 = smov 8  }
  0x28   : > { %518 = dma.hbm_to_vmem [thread:$0]  (!%p779_p11), %s940_s1, 2048, %s772_s19, [#allocation6], %s707_s4, %s707_s4, %s708_s5  }
  0x29   : > { %p24_p1 = scmp.eq.s32.totalorder %s23_s23, 0  ;;  %p33_p2 = scmp.ne.s32.totalorder %s700_s11, %s696_s10 }
  0x2a   : > { %p34_p4 = scmp.eq.s32.totalorder %s704_s12, 0  ;;  %p528_p6 = scmp.lt.s32.totalorder %s704_s12, 2 }
  0x2b   : > { %s818_s8 = scalar_select %p24_p1, %s700_s11, %s26_s22  }
  0x2c   : > { %p35_p8 = por %p34_p4, %p33_p2  ;;  %p949_p10 = scmp.eq.s32.totalorder %s749_s13, 1 }
  0x2d   : > { %s123_s18 = sand.u32 1, %s700_s11   ;;  %s420_s20 = sshll.u32 %s704_s12, 8 }
  0x2e   : > { %p822_p12 = por %p949_p10, %p33_p2  ;;  %s406_s24 = sshll.u32 %s123_s18, 4 }
  0x2f   : > { %s831_s27 = scalar_lea.hbm %s939_s0, %s420_s20  ;;  %s127_s19 = scalar_lea.vmem [#allocation2], %s406_s24 }
  0x30   : > { %s134_s22 = sshll.u32 %s127_s19, 4  ;;  %p833_p11 = pnand %p528_p6, %p35_p8  ;;  %s837_s22 = int_to_ptr.vmem [resolvable:$true] %s134_s22 }
  0x31   : > { %s839_s28 = scalar_lea.sflag [#allocation3], %s123_s18  ;;  %s604_s29 = scalar_lea.hbm %s831_s27, 256 }
  0x32   : > { %p605_p13 = scmp.ne.s32.totalorder %s831_s27, %s604_s29  ;;  %p606_p0 = pneg %p833_p11 }
  0x33   : > { %s609_s6 = scalar_lea.hbm %s939_s0, 512  ;;  %p610_p7 = scmp.lt.u32.totalorder %s831_s27, %s939_s0 }
  0x34   : > { %p607_p3 = pnand %p606_p0, %p605_p13  ;;  %p611_p9 = scmp.lt.u32.totalorder %s609_s6, %s604_s29 }
  0x35   : > { %p613_p2 = scmp.lt.u32.totalorder %s604_s29, %s831_s27 }
  0x36   : > { %p608_p5 = pneg %p607_p3  ;;  %p612_p1 = por %p611_p9, %p610_p7 }
  0x38   : > { %p614_p4 = por %p613_p2, %p612_p1 }
  0x3a   : > { %p615_p6 = pnand %p614_p4, %p608_p5 }
  0x3c   : > { %618 = shalt.err (!%p615_p6)
}
  0x3d   : > { %s619_s18 = scalar_lea.vmem %s837_s22, 256  ;;  %s709_s24 = smov [#allocation2]  }
  0x3e   : > { %p620_p8 = scmp.ne.s32.totalorder %s837_s22, %s619_s18  ;;  %s624_s25 = sshll.u32 %s709_s24, 4  ;;  %s625_s25 = int_to_ptr.vmem [resolvable:$false] %s624_s25 }
  0x3f   : > { %s626_s26 = scalar_lea.vmem %s625_s25, 512  ;;  %p627_p3 = scmp.lt.s32.totalorder %s837_s22, %s625_s25 }
  0x40   : > { %p622_p10 = pnand %p620_p8, %p606_p0  ;;  %p628_p7 = scmp.lt.s32.totalorder %s626_s26, %s619_s18 }
  0x42   : > { %p623_p13 = pneg %p622_p10  ;;  %p629_p9 = por %p628_p7, %p627_p3 }
  0x44   : > { %p630_p1 = pnand %p629_p9, %p623_p13 }
  0x46   : > { %633 = shalt.err (!%p630_p1)
}
  0x47   : > { %522 = dma.hbm_to_vmem [thread:$0]  (!%p833_p11), %s831_s27, 256, %s837_s22, %s839_s28, %s707_s4, %s707_s4, %s708_s5  }
  0x48   : > { %p952_p0 = scmp.ne.s32.totalorder %s947_s17, 0 }
  0x49   : > { %s873_s19 = sand.u32 (!%p952_p0), 1, %s696_s10   ;;  %p953_p5 = scmp.ne.s32.totalorder (!%p952_p0), %s945_s15, 0 }
  0x4a   : > { %146 = sbr.rel (%p952_p0) target bundleno = 559 (0x22f), region = 28  ;;  %s410_s29 = sshll.u32 (!%p952_p0), %s873_s19, 4 }
  0x4b   : > { %s149_s30 = scalar_lea.sflag (!%p952_p0), [#allocation3], %s873_s19  ;;  %s152_s23 = scalar_lea.vmem (!%p952_p0), [#allocation2], %s410_s29 }
  0x51   : > { %679 = dma.done.wait (%p953_p5), %s149_s30, 256  }
  0x52   : > { %681 = vsyncadd (%p953_p5), %s149_s30, 4294967040  ;;  %p954_p11 = scmp.eq.s32.totalorder %s749_s13, 0 }
  0x54   : > { %683 = dma.done.wait (%p954_p11), [#allocation6], 2048   ;;  %p955_p2 = pmov %p954_p11 }
  0x55   : > { %v181_v0 = vld [vmem:[#allocation5] sm:$0xff]  ;;  %v182_v1 = vld [vmem:[#allocation5 + $0x8] sm:$0xff]  ;;  %v183_v2 = vld [vmem:[#allocation5 + $0x10] sm:$0xff]  ;;  %v290_v42 = vlaneseq  ;;  %s421_s15 = sshll.u32 %s749_s13, 8  ;;  %s176_s17 = scalar_lea.vmem [#allocation7], %s410_s29 }
  0x56   : > { %685 = vsyncadd (%p955_p2), [#allocation6], 4294965248  ;;  %v475_v3 = vpack.c.bf16 %v182_v1, %v181_v0  ;;  %v184_v4 = vld [vmem:[#allocation5 + $0x18] sm:$0xff]  ;;  %v179_v6 = vld [vmem:[%s152_s23] sm:$0xff]  ;;  %s319_s4 = sshll.u32 %s176_s17, 4  ;;  %s893_s22 = scalar_lea.hbm %s941_s2, %s421_s15  ;;  %s895_s4 = int_to_ptr.vmem [resolvable:$true] %s319_s4 }
  0x57   : > { %v479_v5 = vpack.c.bf16 %v184_v4, %v183_v2  ;;  %v185_v7 = vld [vmem:[#allocation5 + $0x20] sm:$0xff]  ;;  %v186_v8 = vld [vmem:[#allocation5 + $0x28] sm:$0xff]  ;;  %472 = vmatprep.mubr.f32.mxu0 %v179_v6  ;;  %v197_v9 = vmul.f32 %v179_v6, %v179_v6  ;;  %v187_v13 = vld [vmem:[#allocation5 + $0x30] sm:$0xff]  ;;  %v291_v43 = vand.u32 127, %v290_v42  ;;  %s306_s28 = scalar_lea.sflag [#allocation4], %s873_s19  ;;  %s634_s3 = scalar_lea.vmem %s895_s4, 256 }
  0x58   : > { %476 = vmatprep.subr.bf16.mxu0 %v475_v3  ;;  %v180_v10 = vld [vmem:[%s152_s23 + $0x8] sm:$0xff]  ;;  %v483_v12 = vpack.c.bf16 %v186_v8, %v185_v7  ;;  %v189_v16 = vld [vmem:[#allocation5 + $0x40] sm:$0xff]  ;;  %v191_v19 = vld [vmem:[#allocation5 + $0x50] sm:$0xff]  ;;  %p635_p4 = scmp.ne.s32.totalorder %s895_s4, %s634_s3  ;;  %s710_s13 = smov [#allocation7]  }
  0x59   : > { %478 = vmatpush3.bf16.xpose.msra.mxu0 %v475_v3  ;;  %199 = vadd.xlane.f32.xlu0 %v197_v9  ;;  %v198_v11 = vmul.f32 %v180_v10, %v180_v10  ;;  %v188_v14 = vld [vmem:[#allocation5 + $0x38] sm:$0xff]  ;;  %v190_v17 = vld [vmem:[#allocation5 + $0x48] sm:$0xff]  ;;  %v193_v22 = vld [vmem:[#allocation5 + $0x60] sm:$0xff]  ;;  %vm292_vm0 = vcmp.lt.s32.totalorder %v291_v43, 10  ;;  %s638_s6 = sshll.u32 %s710_s13, 4  ;;  %s639_s6 = int_to_ptr.vmem [resolvable:$false] %s638_s6 }
  0x5a   : > { %480 = vmatprep.subr.bf16.mxu0 %v479_v5  ;;  %v487_v15 = vpack.c.bf16 %v188_v14, %v187_v13  ;;  %v491_v18 = vpack.c.bf16 %v190_v17, %v189_v16  ;;  %v192_v20 = vld [vmem:[#allocation5 + $0x58] sm:$0xff]  ;;  %v194_v23 = vld [vmem:[#allocation5 + $0x68] sm:$0xff]  ;;  %v195_v25 = vld [vmem:[#allocation5 + $0x70] sm:$0xff]  ;;  %p636_p6 = pnand %p635_p4, %p822_p12  ;;  %s640_s7 = scalar_lea.vmem %s639_s6, 512 }
  0x5b   : > { %v495_v21 = vpack.c.bf16 %v192_v20, %v191_v19  ;;  %v499_v24 = vpack.c.bf16 %v194_v23, %v193_v22  ;;  %v196_v26 = vld [vmem:[#allocation5 + $0x78] sm:$0xff]  ;;  %p641_p10 = scmp.lt.s32.totalorder %s895_s4, %s639_s6  ;;  %p642_p13 = scmp.lt.s32.totalorder %s640_s7, %s634_s3 }
  0x5c   : > { %v503_v27 = vpack.c.bf16 %v196_v26, %v195_v25  ;;  %p637_p8 = pneg %p636_p6 }
  0x5d   : > { %201 = vadd.xlane.f32.xlu0 %v198_v11  ;;  %p643_p3 = por %p642_p13, %p641_p10 }
  0x5f   : > { %p644_p7 = pnand %p643_p3, %p637_p8 }
  0x61   : > { %482 = vmatpush3.bf16.xpose.msra.mxu0 %v479_v5 }
  0x62   : > { %484 = vmatprep.subr.bf16.mxu0 %v483_v12 }
  0x69   : > { %486 = vmatpush3.bf16.xpose.msra.mxu0 %v483_v12 }
  0x6a   : > { %488 = vmatprep.subr.bf16.mxu0 %v487_v15 }
  0x71   : > { %490 = vmatpush3.bf16.xpose.msra.mxu0 %v487_v15 }
  0x72   : > { %492 = vmatprep.subr.bf16.mxu0 %v491_v18 }
  0x79   : > { %494 = vmatpush3.bf16.xpose.msra.mxu0 %v491_v18 }
  0x7a   : > { %496 = vmatprep.subr.bf16.mxu0 %v495_v21 }
  0x81   : > { %498 = vmatpush3.bf16.xpose.msra.mxu0 %v495_v21 }
  0x82   : > { %500 = vmatprep.subr.bf16.mxu0 %v499_v24 }
  0x89   : > { %502 = vmatpush3.bf16.xpose.msra.mxu0 %v499_v24 }
  0x8a   : > { %504 = vmatprep.subr.bf16.mxu0 %v503_v27 }
  0x91   : > { %506 = vmatpush3.bf16.xpose.msra.mxu0 %v503_v27 }
  0x98   : > { %473 = vmatmul.mubr.f32.vlgmr.msra.gmra.mrb[0].mxu0 %v180_v10 }
  0xe6   : > { %v200_v28 = vpop.xlane.xlu0 %199 }
  0xe7   : > { %v413_v31 = vadd.f32 -1.0, %v200_v28 }
  0xea   : > { %v202_v29 = vpop.xlane.xlu0 %201 }
  0xeb   : > { %v414_v30 = vadd.f32 -1.0, %v202_v29 }
 0x16b   : > { %v474_v32 = vpop.f32.mrb[0].mxu0 }
 0x16c   : > { %v281_v33 = vmul.f32 2.0, %v474_v32  ;;  %v271_v34 = vpop.f32.mrb[1].mxu0 }
 0x16d   : > { %v280_v35 = vmul.f32 2.0, %v271_v34 }
 0x16e   : > { %v283_v36 = vsub.f32 %v414_v30, %v281_v33 }
 0x16f   : > { %v282_v37 = vsub.f32 %v413_v31, %v280_v35 }
 0x170   : > { %v285_v38 = vmax.f32 %v283_v36, 0.0 }
 0x171   : > { %v284_v39 = vmax.f32 %v282_v37, 0.0 }
 0x172   : > { %v287_v40 = vadd.f32 1.0, %v285_v38 }
 0x173   : > { %v286_v41 = vadd.f32 1.0, %v284_v39 }
 0x175   : > { %568 = vrcp.f32 %v286_v41 }
 0x176   : > { %570 = vrcp.f32 %v287_v40 }
 0x17f   : > { %v569_v44 = vpop.eup %568 }
 0x180   : > { %v293_v45 = vsel %vm292_vm0, %v569_v44, 0.0  ;;  %v571_v46 = vpop.eup %570 }
 0x181   : > { %295 = vadd.xlane.f32.xlu1 %v293_v45  ;;  %v294_v47 = vsel %vm292_vm0, %v571_v46, 0.0 }
 0x185   : > { %297 = vadd.xlane.f32.xlu1 %v294_v47 }
 0x20e   : > { %v296_v48 = vpop.xlane.xlu1 %295 }
 0x20f   : > { %572 = vrcp.f32 %v296_v48 }
 0x212   : > { %v298_v49 = vpop.xlane.xlu1 %297 }
 0x213   : > { %574 = vrcp.f32 %v298_v49 }
 0x219   : > { %v573_v50 = vpop.eup %572 }
 0x21a   : > { %v301_v51 = vmul.f32 %v573_v50, %v293_v45 }
 0x21c   : > { %303 = vst [vmem:[%s176_s17] sm:$0xff] %v301_v51 }
 0x21d   : > { %v575_v52 = vpop.eup %574 }
 0x21e   : > { %v302_v53 = vmul.f32 %v575_v52, %v294_v47 }
 0x220   : > { %304 = vst [vmem:[%s176_s17 + $0x8] sm:$0xff] %v302_v53 }
 0x221   : > { %647 = shalt.err (!%p644_p7)
}
 0x222   : > { %s648_s20 = scalar_lea.hbm %s893_s22, 256  ;;  %s652_s25 = scalar_lea.hbm %s941_s2, 512 }
 0x223   : > { %p649_p9 = scmp.ne.s32.totalorder %s893_s22, %s648_s20  ;;  %p653_p5 = scmp.lt.u32.totalorder %s893_s22, %s941_s2 }
 0x224   : > { %p654_p11 = scmp.lt.u32.totalorder %s652_s25, %s648_s20  ;;  %p656_p4 = scmp.lt.u32.totalorder %s648_s20, %s893_s22 }
 0x225   : > { %p650_p1 = pnand %p649_p9, %p822_p12 }
 0x226   : > { %p655_p2 = por %p654_p11, %p653_p5 }
 0x227   : > { %p651_p0 = pneg %p650_p1 }
 0x228   : > { %p657_p6 = por %p656_p4, %p655_p2 }
 0x22a   : > { %p658_p8 = pnand %p657_p6, %p651_p0 }
 0x22c   : > { %661 = shalt.err (!%p658_p8)
}
 0x22d   : > { %s711_s30 = smov 128   ;;  %s712_s23 = smov 8  }
 0x22e   : > { %513 = dma.vmem_to_hbm [thread:$0]  (%p822_p12), %s895_s4, 256, %s893_s22, %s306_s28, %s711_s30, %s711_s30, %s712_s23  }
 0x22f PF: > { %s334_s15 = sand.u32 1, %s692_s9   ;;  %p956_p10 = scmp.ne.s32.totalorder %s946_s16, 0 }
 0x230   : > { %p957_p13 = scmp.ge.s32.totalorder %s704_s12, 2  ;;  %s335_s17 = scalar_lea.sflag [#allocation4], %s334_s15 }
 0x232   : > { %p524_p3 = pnand %p957_p13, %p956_p10 }
 0x234   : > { %687 = dma.done.wait (!%p524_p3), %s335_s17, 256  }
 0x235   : > { %689 = vsyncadd (!%p524_p3), %s335_s17, 4294967040  ;;  %p16_p7 = scmp.ge.s32.totalorder %s784_s21, 4   ;;  %s958_s9 = smov %s696_s10 }
 0x236   : > { %s959_s10 = smov %s700_s11  ;;  %s960_s11 = smov %s818_s8 }
 0x237   : > { %s961_s12 = smov %s784_s21  ;;  %18 = sbr.rel (!%p16_p7) target bundleno = 6 (0x6), region = 77 }
 0x23e   :  { %340 = vsyncpa [#allocation3], 1 }
 0x23f   :  { %342 = vsyncpa [#allocation3 + $0x1], 1 }
 0x240   :  { %343 = vsyncpa [#allocation6], 1 }
 0x241   :  { %344 = vsyncpa [#allocation4], 1 }
 0x242   :  { %346 = vsyncpa [#allocation4 + $0x1], 1 }

</bundles_post_ra>
